<compile_context>
chip_gen: v7x
topology: tpu7x:2x2x1
jax: 0.10.0
libtpu: 0.0.40
codegen_flags: <defaults>
</compile_context>

<pallas_src>
import functools

import jax
import jax.numpy as jnp
from jax.experimental import pallas as pl
from jax.experimental.pallas import tpu as pltpu

BN_EPS = 1e-5          # nn.BatchNorm2d default
LANES = 128


def _round_up(x, m):
    return ((x + m - 1) // m) * m


def _vmem_capacity_bytes():
    """Generation-aware VMEM capacity (v5e/v6e: 128 MiB, v7x: 64 MiB)."""
    try:
        info = pltpu.get_tpu_info()
        cap = getattr(info, "vmem_capacity_bytes", None)
        if cap:
            return int(cap)
    except Exception:
        pass
    return 64 * 1024 * 1024   # conservative fallback = smallest (v7x) VMEM


def _conv_stats_kernel(w_ref, x_ref, y_ref, s_ref, sq_ref, *, img_w):
    """In-kernel 3x3 conv (9 shifted matmuls) + per-channel batch-stat partials.

    w_ref:  (9, Cout, Cin)   bf16 resident tap matrices, tap t = kh*3 + kw
    x_ref:  (IPB, Cin, Fb)   bf16 row-padded flattened images (+1-elem margins)
    y_ref:  (IPB, Cout, HW)  bf16 pre-BN conv output, lane-dense NC(HW) layout
    s_ref:  (IPB, Cout, 1)   f32 per-image per-channel sum
    sq_ref: (IPB, Cout, 1)   f32 per-image per-channel sum of squares
    """
    ipb, cout, hw = y_ref.shape

    # Column masks for the kw=0 / kw=2 tap groups: the flattened shifted loads
    # wrap across image rows, which must behave like the conv's zero pad in W.
    lane = jax.lax.broadcasted_iota(jnp.int32, (1, hw), 1)
    wpos = lane % img_w
    keep_l = wpos > 0              # kw = 0 taps invalid where w == 0
    keep_r = wpos < img_w - 1      # kw = 2 taps invalid where w == W-1

    for b in range(ipb):
        acc = jnp.zeros((cout, hw), jnp.float32)
        for kw in range(3):
            grp = jnp.zeros((cout, hw), jnp.float32)
            for kh in range(3):
                # Value for compact output pixel m is xbuf[m + kh*W + kw].
                xs = x_ref[b, :, pl.ds(kh * img_w + kw, hw)]     # (Cin, HW)
                grp = grp + jnp.dot(w_ref[kh * 3 + kw], xs,
                                    preferred_element_type=jnp.float32)
            if kw == 0:
                grp = jnp.where(keep_l, grp, 0.0)
            elif kw == 2:
                grp = jnp.where(keep_r, grp, 0.0)
            acc = acc + grp
        # NOTE: conv bias intentionally omitted — training-mode BN cancels it.
        y_ref[b] = acc.astype(y_ref.dtype)
        s_ref[b] = jnp.sum(acc, axis=-1, keepdims=True)          # (Cout, 1)
        sq_ref[b] = jnp.sum(acc * acc, axis=-1, keepdims=True)   # (Cout, 1)


def _bn_relu_kernel(y_ref, scale_ref, shift_ref, o_ref):
    """Per-channel affine BN + ReLU on lane-dense NC(HW) slabs."""
    y = y_ref[...].astype(jnp.float32)                 # (IPB, Cout, HW)
    o = y * scale_ref[...] + shift_ref[...]            # (Cout, 1) broadcasts
    o_ref[...] = jnp.maximum(o, 0.0).astype(o_ref.dtype)


def conv_block_forward(x_nchw, weight, bias, gamma, beta):
    """Conv2d(3x3, s=1, p=1, bias) -> BatchNorm2d (batch stats) -> ReLU."""
    del bias  # exactly cancelled by training-mode BN (batch mean absorbs it)
    # TODO(synk): re-add the conv bias if eval-mode (running-stats) BN is needed.

    N, Cin, H, W = x_nchw.shape
    Cout = weight.shape[0]
    HW = H * W
    F = (H + 2) * W                        # row-padded flattened image length
    Fb = _round_up(HW + 2 * W + 2, LANES)  # + 1-elem halo margins, lane aligned

    # ---- Host-side glue: pad H by 1, flatten (free), add flat margins, bf16.
    xr = jnp.pad(x_nchw, ((0, 0), (0, 0), (1, 1), (0, 0))).reshape(N, Cin, F)
    xbuf = jnp.pad(xr, ((0, 0), (0, 0), (1, Fb - F - 1))).astype(jnp.bfloat16)
    w9 = weight.transpose(2, 3, 0, 1).reshape(9, Cout, Cin).astype(jnp.bfloat16)

    # ---- Generation-aware image-block sizing (v7x has half the VMEM). ----
    vmem_cap = _vmem_capacity_bytes()
    per_img = Cin * Fb * 2 + Cout * HW * 2 + Cout * 8         # streamed bytes
    scratch = 2 * Cout * HW * 4                               # live f32 acc
    budget = int(0.35 * vmem_cap)
    ipb = max(1, budget // max(1, 2 * per_img + scratch))     # double-buffered
    ipb = int(min(ipb, 8, max(1, (N + 1) // 2)))              # keep >= 2 steps
    n_pad = _round_up(N, ipb)
    if n_pad != N:
        # Zero images contribute exactly zero to the stats (no conv bias).
        xbuf = jnp.pad(xbuf, ((0, n_pad - N), (0, 0), (0, 0)))
    grid = (n_pad // ipb,)
    # TODO(synk): for images too large for one VMEM block, add row-block tiling
    # with a manual halo DMA (pl.ANY + make_async_copy) instead of whole images.

    compiler_params = pltpu.CompilerParams(
        dimension_semantics=("parallel",),
        vmem_limit_bytes=min(int(0.7 * vmem_cap), 64 * 1024 * 1024),
    )

    # ---- Pass 1: in-kernel 3x3 conv + per-image channel stats. ----
    flops = 2 * n_pad * HW * 9 * Cin * Cout
    bytes1 = (2 * n_pad * Cin * Fb + 2 * 9 * Cout * Cin
              + 2 * n_pad * Cout * HW + 8 * n_pad * Cout)
    # TODO(synk): mark w9 with pipeline_mode=pl.Buffered(1) (single-buffered
    # resident weights) once large Cout*Cin makes the second buffer matter.
    y_pre, psum, psq = pl.pallas_call(
        functools.partial(_conv_stats_kernel, img_w=W),
        out_shape=(
            jax.ShapeDtypeStruct((n_pad, Cout, HW), jnp.bfloat16),
            jax.ShapeDtypeStruct((n_pad, Cout, 1), jnp.float32),
            jax.ShapeDtypeStruct((n_pad, Cout, 1), jnp.float32),
        ),
        grid=grid,
        in_specs=[
            pl.BlockSpec((9, Cout, Cin), lambda i: (0, 0, 0)),    # resident
            pl.BlockSpec((ipb, Cin, Fb), lambda i: (i, 0, 0)),    # streamed
        ],
        out_specs=(
            pl.BlockSpec((ipb, Cout, HW), lambda i: (i, 0, 0)),
            pl.BlockSpec((ipb, Cout, 1), lambda i: (i, 0, 0)),
            pl.BlockSpec((ipb, Cout, 1), lambda i: (i, 0, 0)),
        ),
        compiler_params=compiler_params,
        cost_estimate=pl.CostEstimate(
            flops=flops, transcendentals=0, bytes_accessed=bytes1),
    )(w9, xbuf)

    # ---- Tiny host-side reduction of per-image stats -> BN affine params. ----
    cnt = float(N * HW)
    ch_sum = jnp.sum(psum[:, :, 0], axis=0)                    # (Cout,)
    ch_sqsum = jnp.sum(psq[:, :, 0], axis=0)                   # (Cout,)
    mean = ch_sum / cnt
    var = jnp.maximum(ch_sqsum / cnt - mean * mean, 0.0)       # biased variance
    inv_std = jax.lax.rsqrt(var + BN_EPS)
    scale = (gamma * inv_std).reshape(Cout, 1).astype(jnp.float32)
    shift = (beta - mean * gamma * inv_std).reshape(Cout, 1).astype(jnp.float32)

    # ---- Pass 2: per-channel affine BN + ReLU over NC(HW) slabs. ----
    out_flat = pl.pallas_call(
        _bn_relu_kernel,
        out_shape=jax.ShapeDtypeStruct((n_pad, Cout, HW), jnp.float32),
        grid=grid,
        in_specs=[
            pl.BlockSpec((ipb, Cout, HW), lambda i: (i, 0, 0)),
            pl.BlockSpec((Cout, 1), lambda i: (0, 0)),
            pl.BlockSpec((Cout, 1), lambda i: (0, 0)),
        ],
        out_specs=pl.BlockSpec((ipb, Cout, HW), lambda i: (i, 0, 0)),
        compiler_params=compiler_params,
        cost_estimate=pl.CostEstimate(
            flops=2 * n_pad * Cout * HW, transcendentals=0,
            bytes_accessed=6 * n_pad * Cout * HW),
    )(y_pre, scale, shift)

    # ---- Free reshape: (N, Cout, H*W) -> NCHW (no transpose pass). ----
    return out_flat[:N].reshape(N, Cout, H, W)


if __name__ == "__main__":
    # Small shapes consistent with the module: batch=2, in_channels=4,
    # out_channels=8, spatial 16x16.
    N, Cin, Cout, H, W = 2, 4, 8, 16, 16

    key = jax.random.PRNGKey(0)
    kx, kw, kb, kg, kbe = jax.random.split(key, 5)

    x = jax.random.normal(kx, (N, Cin, H, W), dtype=jnp.float32)
    weight = 0.1 * jax.random.normal(kw, (Cout, Cin, 3, 3), dtype=jnp.float32)
    bias = 0.1 * jax.random.normal(kb, (Cout,), dtype=jnp.float32)
    gamma = 1.0 + 0.1 * jax.random.normal(kg, (Cout,), dtype=jnp.float32)
    beta = 0.1 * jax.random.normal(kbe, (Cout,), dtype=jnp.float32)

    out = conv_block_forward(x, weight, bias, gamma, beta)
    jax.block_until_ready(out)

    # Pure-JAX f32 reference: Conv2d(+bias) -> training-mode BatchNorm2d -> ReLU.
    conv_ref = jax.lax.conv_general_dilated(
        x, weight, window_strides=(1, 1), padding=((1, 1), (1, 1)),
        dimension_numbers=("NCHW", "OIHW", "NCHW"),
        precision=jax.lax.Precision.HIGHEST) + bias.reshape(1, Cout, 1, 1)
    mu = jnp.mean(conv_ref, axis=(0, 2, 3), keepdims=True)
    var = jnp.var(conv_ref, axis=(0, 2, 3), keepdims=True)    # biased, as BN uses
    ref = (conv_ref - mu) * jax.lax.rsqrt(var + BN_EPS)
    ref = ref * gamma.reshape(1, Cout, 1, 1) + beta.reshape(1, Cout, 1, 1)
    ref = jnp.maximum(ref, 0.0)

    assert out.shape == (N, Cout, H, W), out.shape
    assert bool(jnp.all(out >= 0.0))                          # ReLU applied
    err = float(jnp.max(jnp.abs(out - ref)))
    # Streamed operands and the pre-BN intermediate are bf16 (f32 accumulation);
    # post-BN outputs are ~unit-variance, so allow ~7.5% of one sigma vs the
    # full-f32 reference.
    assert err < 7.5e-2, f"max abs error vs reference: {err}"
    print("KERNEL_OK")
</pallas_src>

<mosaic_0001>
module attributes {stable_mosaic.version = 11 : i64} {
  func.func @_conv_stats_kernel(%arg0: i32, %arg1: memref<9x8x4xbf16, #tpu.memory_space<vmem>>, %arg2: memref<1x4x384xbf16, #tpu.memory_space<vmem>>, %arg3: memref<1x8x256xbf16, #tpu.memory_space<vmem>>, %arg4: memref<1x8x1xf32, #tpu.memory_space<vmem>>, %arg5: memref<1x8x1xf32, #tpu.memory_space<vmem>>) attributes {dimension_semantics = [#tpu.dimension_semantics<parallel>], iteration_bounds = array<i64: 2>, scalar_prefetch = 0 : i64, scratch_operands = 0 : i64, tpu.core_type = #tpu.core_type<tc>, window_params = [{pipeline_mode = #tpu.pipeline_mode<synchronous>, transform_indices = @transform_0, window_bounds = array<i64: 9, 8, 4>}, {transform_indices = @transform_1, window_bounds = array<i64: 1, 4, 384>}, {transform_indices = @transform_2, window_bounds = array<i64: 1, 8, 256>}, {transform_indices = @transform_3, window_bounds = array<i64: 1, 8, 1>}, {transform_indices = @transform_4, window_bounds = array<i64: 1, 8, 1>}]} {
    %0 = tpu.iota {dimensions = array<i32: 1>} : vector<1x256xi32>
    %c16_i32 = arith.constant 16 : i32
    %c0_i32 = arith.constant 0 : i32
    %1 = arith.cmpi eq, %c16_i32, %c0_i32 : i32
    %c1_i32 = arith.constant 1 : i32
    %2 = arith.select %1, %c1_i32, %c16_i32 : i32
    %3 = vector.broadcast %2 : i32 to vector<1x256xi32>
    %4 = arith.remsi %0, %3 : vector<1x256xi32>
    %c0_i32_0 = arith.constant 0 : i32
    %5 = vector.broadcast %c0_i32_0 : i32 to vector<1x256xi32>
    %6 = arith.cmpi ne, %4, %5 : vector<1x256xi32>
    %c0_i32_1 = arith.constant 0 : i32
    %7 = vector.broadcast %c0_i32_1 : i32 to vector<1x256xi32>
    %8 = arith.cmpi slt, %4, %7 : vector<1x256xi32>
    %c0_i32_2 = arith.constant 0 : i32
    %9 = arith.cmpi slt, %2, %c0_i32_2 : i32
    %10 = vector.broadcast %9 : i1 to vector<1x256xi1>
    %11 = vector.broadcast %10 : vector<1x256xi1> to vector<1x256xi1>
    %12 = arith.xori %8, %11 : vector<1x256xi1>
    %13 = arith.andi %12, %6 : vector<1x256xi1>
    %14 = vector.broadcast %2 : i32 to vector<1x256xi32>
    %15 = arith.addi %4, %14 : vector<1x256xi32>
    %16 = arith.select %13, %15, %4 : vector<1x256xi1>, vector<1x256xi32>
    %c0_i32_3 = arith.constant 0 : i32
    %17 = vector.broadcast %c0_i32_3 : i32 to vector<1x256xi32>
    %18 = arith.cmpi sgt, %16, %17 : vector<1x256xi32>
    %c15_i32 = arith.constant 15 : i32
    %19 = vector.broadcast %c15_i32 : i32 to vector<1x256xi32>
    %20 = arith.cmpi slt, %16, %19 : vector<1x256xi32>
    %cst = arith.constant 0.000000e+00 : f32
    %21 = vector.broadcast %cst : f32 to vector<8x256xf32>
    %cst_4 = arith.constant 0.000000e+00 : f32
    %22 = vector.broadcast %cst_4 : f32 to vector<8x256xf32>
    %c0 = arith.constant 0 : index
    %c0_5 = arith.constant 0 : index
    %c0_6 = arith.constant 0 : index
    %23 = vector.load %arg2[%c0, %c0_5, %c0_6] : memref<1x4x384xbf16, #tpu.memory_space<vmem>>, vector<1x4x256xbf16>
    %24 = vector.shape_cast %23 : vector<1x4x256xbf16> to vector<4x256xbf16>
    %c0_7 = arith.constant 0 : index
    %c0_8 = arith.constant 0 : index
    %c0_9 = arith.constant 0 : index
    %25 = vector.load %arg1[%c0_7, %c0_8, %c0_9] : memref<9x8x4xbf16, #tpu.memory_space<vmem>>, vector<1x8x4xbf16>
    %26 = vector.shape_cast %25 : vector<1x8x4xbf16> to vector<8x4xbf16>
    %cst_10 = arith.constant dense<0.000000e+00> : vector<8x256xf32>
    %27 = tpu.matmul %26, %24, %cst_10 {dimension_numbers = #tpu.dot_dimension_numbers<[1], [0], [0], [1], [0, 0, 1, 1], [], []>} : vector<8x4xbf16>, vector<4x256xbf16>, vector<8x256xf32> -> vector<8x256xf32>
    %28 = arith.addf %22, %27 : vector<8x256xf32>
    %c0_11 = arith.constant 0 : index
    %c0_12 = arith.constant 0 : index
    %c16 = arith.constant 16 : index
    %29 = vector.load %arg2[%c0_11, %c0_12, %c16] : memref<1x4x384xbf16, #tpu.memory_space<vmem>>, vector<1x4x256xbf16>
    %30 = vector.shape_cast %29 : vector<1x4x256xbf16> to vector<4x256xbf16>
    %c3 = arith.constant 3 : index
    %c0_13 = arith.constant 0 : index
    %c0_14 = arith.constant 0 : index
    %31 = vector.load %arg1[%c3, %c0_13, %c0_14] : memref<9x8x4xbf16, #tpu.memory_space<vmem>>, vector<1x8x4xbf16>
    %32 = vector.shape_cast %31 : vector<1x8x4xbf16> to vector<8x4xbf16>
    %cst_15 = arith.constant dense<0.000000e+00> : vector<8x256xf32>
    %33 = tpu.matmul %32, %30, %cst_15 {dimension_numbers = #tpu.dot_dimension_numbers<[1], [0], [0], [1], [0, 0, 1, 1], [], []>} : vector<8x4xbf16>, vector<4x256xbf16>, vector<8x256xf32> -> vector<8x256xf32>
    %34 = arith.addf %28, %33 : vector<8x256xf32>
    %c0_16 = arith.constant 0 : index
    %c0_17 = arith.constant 0 : index
    %c32 = arith.constant 32 : index
    %35 = vector.load %arg2[%c0_16, %c0_17, %c32] : memref<1x4x384xbf16, #tpu.memory_space<vmem>>, vector<1x4x256xbf16>
    %36 = vector.shape_cast %35 : vector<1x4x256xbf16> to vector<4x256xbf16>
    %c6 = arith.constant 6 : index
    %c0_18 = arith.constant 0 : index
    %c0_19 = arith.constant 0 : index
    %37 = vector.load %arg1[%c6, %c0_18, %c0_19] : memref<9x8x4xbf16, #tpu.memory_space<vmem>>, vector<1x8x4xbf16>
    %38 = vector.shape_cast %37 : vector<1x8x4xbf16> to vector<8x4xbf16>
    %cst_20 = arith.constant dense<0.000000e+00> : vector<8x256xf32>
    %39 = tpu.matmul %38, %36, %cst_20 {dimension_numbers = #tpu.dot_dimension_numbers<[1], [0], [0], [1], [0, 0, 1, 1], [], []>} : vector<8x4xbf16>, vector<4x256xbf16>, vector<8x256xf32> -> vector<8x256xf32>
    %40 = arith.addf %34, %39 : vector<8x256xf32>
    %cst_21 = arith.constant 0.000000e+00 : f32
    %41 = vector.shape_cast %18 : vector<1x256xi1> to vector<1x256xi1>
    %42 = vector.broadcast %41 : vector<1x256xi1> to vector<8x256xi1>
    %43 = vector.broadcast %cst_21 : f32 to vector<8x256xf32>
    %44 = arith.select %42, %40, %43 : vector<8x256xi1>, vector<8x256xf32>
    %45 = arith.addf %21, %44 : vector<8x256xf32>
    %cst_22 = arith.constant 0.000000e+00 : f32
    %46 = vector.broadcast %cst_22 : f32 to vector<8x256xf32>
    %c0_23 = arith.constant 0 : index
    %c0_24 = arith.constant 0 : index
    %c1 = arith.constant 1 : index
    %47 = vector.load %arg2[%c0_23, %c0_24, %c1] : memref<1x4x384xbf16, #tpu.memory_space<vmem>>, vector<1x4x256xbf16>
    %48 = vector.shape_cast %47 : vector<1x4x256xbf16> to vector<4x256xbf16>
    %c1_25 = arith.constant 1 : index
    %c0_26 = arith.constant 0 : index
    %c0_27 = arith.constant 0 : index
    %49 = vector.load %arg1[%c1_25, %c0_26, %c0_27] : memref<9x8x4xbf16, #tpu.memory_space<vmem>>, vector<1x8x4xbf16>
    %50 = vector.shape_cast %49 : vector<1x8x4xbf16> to vector<8x4xbf16>
    %cst_28 = arith.constant dense<0.000000e+00> : vector<8x256xf32>
    %51 = tpu.matmul %50, %48, %cst_28 {dimension_numbers = #tpu.dot_dimension_numbers<[1], [0], [0], [1], [0, 0, 1, 1], [], []>} : vector<8x4xbf16>, vector<4x256xbf16>, vector<8x256xf32> -> vector<8x256xf32>
    %52 = arith.addf %46, %51 : vector<8x256xf32>
    %c0_29 = arith.constant 0 : index
    %c0_30 = arith.constant 0 : index
    %c17 = arith.constant 17 : index
    %53 = vector.load %arg2[%c0_29, %c0_30, %c17] : memref<1x4x384xbf16, #tpu.memory_space<vmem>>, vector<1x4x256xbf16>
    %54 = vector.shape_cast %53 : vector<1x4x256xbf16> to vector<4x256xbf16>
    %c4 = arith.constant 4 : index
    %c0_31 = arith.constant 0 : index
    %c0_32 = arith.constant 0 : index
    %55 = vector.load %arg1[%c4, %c0_31, %c0_32] : memref<9x8x4xbf16, #tpu.memory_space<vmem>>, vector<1x8x4xbf16>
    %56 = vector.shape_cast %55 : vector<1x8x4xbf16> to vector<8x4xbf16>
    %cst_33 = arith.constant dense<0.000000e+00> : vector<8x256xf32>
    %57 = tpu.matmul %56, %54, %cst_33 {dimension_numbers = #tpu.dot_dimension_numbers<[1], [0], [0], [1], [0, 0, 1, 1], [], []>} : vector<8x4xbf16>, vector<4x256xbf16>, vector<8x256xf32> -> vector<8x256xf32>
    %58 = arith.addf %52, %57 : vector<8x256xf32>
    %c0_34 = arith.constant 0 : index
    %c0_35 = arith.constant 0 : index
    %c33 = arith.constant 33 : index
    %59 = vector.load %arg2[%c0_34, %c0_35, %c33] : memref<1x4x384xbf16, #tpu.memory_space<vmem>>, vector<1x4x256xbf16>
    %60 = vector.shape_cast %59 : vector<1x4x256xbf16> to vector<4x256xbf16>
    %c7 = arith.constant 7 : index
    %c0_36 = arith.constant 0 : index
    %c0_37 = arith.constant 0 : index
    %61 = vector.load %arg1[%c7, %c0_36, %c0_37] : memref<9x8x4xbf16, #tpu.memory_space<vmem>>, vector<1x8x4xbf16>
    %62 = vector.shape_cast %61 : vector<1x8x4xbf16> to vector<8x4xbf16>
    %cst_38 = arith.constant dense<0.000000e+00> : vector<8x256xf32>
    %63 = tpu.matmul %62, %60, %cst_38 {dimension_numbers = #tpu.dot_dimension_numbers<[1], [0], [0], [1], [0, 0, 1, 1], [], []>} : vector<8x4xbf16>, vector<4x256xbf16>, vector<8x256xf32> -> vector<8x256xf32>
    %64 = arith.addf %58, %63 : vector<8x256xf32>
    %65 = arith.addf %45, %64 : vector<8x256xf32>
    %cst_39 = arith.constant 0.000000e+00 : f32
    %66 = vector.broadcast %cst_39 : f32 to vector<8x256xf32>
    %c0_40 = arith.constant 0 : index
    %c0_41 = arith.constant 0 : index
    %c2 = arith.constant 2 : index
    %67 = vector.load %arg2[%c0_40, %c0_41, %c2] : memref<1x4x384xbf16, #tpu.memory_space<vmem>>, vector<1x4x256xbf16>
    %68 = vector.shape_cast %67 : vector<1x4x256xbf16> to vector<4x256xbf16>
    %c2_42 = arith.constant 2 : index
    %c0_43 = arith.constant 0 : index
    %c0_44 = arith.constant 0 : index
    %69 = vector.load %arg1[%c2_42, %c0_43, %c0_44] : memref<9x8x4xbf16, #tpu.memory_space<vmem>>, vector<1x8x4xbf16>
    %70 = vector.shape_cast %69 : vector<1x8x4xbf16> to vector<8x4xbf16>
    %cst_45 = arith.constant dense<0.000000e+00> : vector<8x256xf32>
    %71 = tpu.matmul %70, %68, %cst_45 {dimension_numbers = #tpu.dot_dimension_numbers<[1], [0], [0], [1], [0, 0, 1, 1], [], []>} : vector<8x4xbf16>, vector<4x256xbf16>, vector<8x256xf32> -> vector<8x256xf32>
    %72 = arith.addf %66, %71 : vector<8x256xf32>
    %c0_46 = arith.constant 0 : index
    %c0_47 = arith.constant 0 : index
    %c18 = arith.constant 18 : index
    %73 = vector.load %arg2[%c0_46, %c0_47, %c18] : memref<1x4x384xbf16, #tpu.memory_space<vmem>>, vector<1x4x256xbf16>
    %74 = vector.shape_cast %73 : vector<1x4x256xbf16> to vector<4x256xbf16>
    %c5 = arith.constant 5 : index
    %c0_48 = arith.constant 0 : index
    %c0_49 = arith.constant 0 : index
    %75 = vector.load %arg1[%c5, %c0_48, %c0_49] : memref<9x8x4xbf16, #tpu.memory_space<vmem>>, vector<1x8x4xbf16>
    %76 = vector.shape_cast %75 : vector<1x8x4xbf16> to vector<8x4xbf16>
    %cst_50 = arith.constant dense<0.000000e+00> : vector<8x256xf32>
    %77 = tpu.matmul %76, %74, %cst_50 {dimension_numbers = #tpu.dot_dimension_numbers<[1], [0], [0], [1], [0, 0, 1, 1], [], []>} : vector<8x4xbf16>, vector<4x256xbf16>, vector<8x256xf32> -> vector<8x256xf32>
    %78 = arith.addf %72, %77 : vector<8x256xf32>
    %c0_51 = arith.constant 0 : index
    %c0_52 = arith.constant 0 : index
    %c34 = arith.constant 34 : index
    %79 = vector.load %arg2[%c0_51, %c0_52, %c34] : memref<1x4x384xbf16, #tpu.memory_space<vmem>>, vector<1x4x256xbf16>
    %80 = vector.shape_cast %79 : vector<1x4x256xbf16> to vector<4x256xbf16>
    %c8 = arith.constant 8 : index
    %c0_53 = arith.constant 0 : index
    %c0_54 = arith.constant 0 : index
    %81 = vector.load %arg1[%c8, %c0_53, %c0_54] : memref<9x8x4xbf16, #tpu.memory_space<vmem>>, vector<1x8x4xbf16>
    %82 = vector.shape_cast %81 : vector<1x8x4xbf16> to vector<8x4xbf16>
    %cst_55 = arith.constant dense<0.000000e+00> : vector<8x256xf32>
    %83 = tpu.matmul %82, %80, %cst_55 {dimension_numbers = #tpu.dot_dimension_numbers<[1], [0], [0], [1], [0, 0, 1, 1], [], []>} : vector<8x4xbf16>, vector<4x256xbf16>, vector<8x256xf32> -> vector<8x256xf32>
    %84 = arith.addf %78, %83 : vector<8x256xf32>
    %cst_56 = arith.constant 0.000000e+00 : f32
    %85 = vector.shape_cast %20 : vector<1x256xi1> to vector<1x256xi1>
    %86 = vector.broadcast %85 : vector<1x256xi1> to vector<8x256xi1>
    %87 = vector.broadcast %cst_56 : f32 to vector<8x256xf32>
    %88 = arith.select %86, %84, %87 : vector<8x256xi1>, vector<8x256xf32>
    %89 = arith.addf %65, %88 : vector<8x256xf32>
    %90 = arith.truncf %89 : vector<8x256xf32> to vector<8x256xbf16>
    %c0_57 = arith.constant 0 : index
    %c0_58 = arith.constant 0 : index
    %c0_59 = arith.constant 0 : index
    %91 = vector.load %arg3[%c0_57, %c0_58, %c0_59] : memref<1x8x256xbf16, #tpu.memory_space<vmem>>, vector<1x8x256xbf16>
    %92 = vector.shape_cast %91 : vector<1x8x256xbf16> to vector<8x256xbf16>
    %93 = vector.shape_cast %90 : vector<8x256xbf16> to vector<1x8x256xbf16>
    tpu.vector_store %arg3[%c0_57, %c0_58, %c0_59], %93 {strides = array<i32>} : memref<1x8x256xbf16, #tpu.memory_space<vmem>>, vector<1x8x256xbf16>,
    %cst_60 = arith.constant dense<0.000000e+00> : vector<8xf32>
    %94 = vector.multi_reduction <add>, %89, %cst_60 [1] : vector<8x256xf32> to vector<8xf32>
    %95 = vector.shape_cast %94 : vector<8xf32> to vector<8x1xf32>
    %c0_61 = arith.constant 0 : index
    %c0_62 = arith.constant 0 : index
    %c0_63 = arith.constant 0 : index
    %96 = vector.load %arg4[%c0_61, %c0_62, %c0_63] : memref<1x8x1xf32, #tpu.memory_space<vmem>>, vector<1x8x1xf32>
    %97 = vector.shape_cast %96 : vector<1x8x1xf32> to vector<8x1xf32>
    %98 = vector.shape_cast %95 : vector<8x1xf32> to vector<1x8x1xf32>
    tpu.vector_store %arg4[%c0_61, %c0_62, %c0_63], %98 {strides = array<i32>} : memref<1x8x1xf32, #tpu.memory_space<vmem>>, vector<1x8x1xf32>,
    %99 = arith.mulf %89, %89 : vector<8x256xf32>
    %cst_64 = arith.constant dense<0.000000e+00> : vector<8xf32>
    %100 = vector.multi_reduction <add>, %99, %cst_64 [1] : vector<8x256xf32> to vector<8xf32>
    %101 = vector.shape_cast %100 : vector<8xf32> to vector<8x1xf32>
    %c0_65 = arith.constant 0 : index
    %c0_66 = arith.constant 0 : index
    %c0_67 = arith.constant 0 : index
    %102 = vector.load %arg5[%c0_65, %c0_66, %c0_67] : memref<1x8x1xf32, #tpu.memory_space<vmem>>, vector<1x8x1xf32>
    %103 = vector.shape_cast %102 : vector<1x8x1xf32> to vector<8x1xf32>
    %104 = vector.shape_cast %101 : vector<8x1xf32> to vector<1x8x1xf32>
    tpu.vector_store %arg5[%c0_65, %c0_66, %c0_67], %104 {strides = array<i32>} : memref<1x8x1xf32, #tpu.memory_space<vmem>>, vector<1x8x1xf32>,
    return
  }
  func.func @transform_0(%arg0: i32) -> (i32, i32, i32) {
    %c0_i32 = arith.constant 0 : i32
    %c0_i32_0 = arith.constant 0 : i32
    %c0_i32_1 = arith.constant 0 : i32
    %c0_i32_2 = arith.constant 0 : i32
    return %c0_i32, %c0_i32_0, %c0_i32_1 : i32, i32, i32
  }
  func.func @transform_1(%arg0: i32) -> (i32, i32, i32) {
    %c0_i32 = arith.constant 0 : i32
    %c0_i32_0 = arith.constant 0 : i32
    %c0_i32_1 = arith.constant 0 : i32
    return %arg0, %c0_i32, %c0_i32_0 : i32, i32, i32
  }
  func.func @transform_2(%arg0: i32) -> (i32, i32, i32) {
    %c0_i32 = arith.constant 0 : i32
    %c0_i32_0 = arith.constant 0 : i32
    %c0_i32_1 = arith.constant 0 : i32
    return %arg0, %c0_i32, %c0_i32_0 : i32, i32, i32
  }
  func.func @transform_3(%arg0: i32) -> (i32, i32, i32) {
    %c0_i32 = arith.constant 0 : i32
    %c0_i32_0 = arith.constant 0 : i32
    %c0_i32_1 = arith.constant 0 : i32
    return %arg0, %c0_i32, %c0_i32_0 : i32, i32, i32
  }
  func.func @transform_4(%arg0: i32) -> (i32, i32, i32) {
    %c0_i32 = arith.constant 0 : i32
    %c0_i32_0 = arith.constant 0 : i32
    %c0_i32_1 = arith.constant 0 : i32
    return %arg0, %c0_i32, %c0_i32_0 : i32, i32, i32
  }
}

</mosaic_0001>

<bundles_post_ra>
// kernel: tpu_custom_call.1
= control target key start
LH: loop header
LB: loop body
LE: loop exit
PB: predicated region body
PF: predicated region fallthrough
CT: control target
= control target key end

     0   :  { %10 = vsyncpa [#allocation3], 0  ;;  %s1493_s0 = inlined_call_operand.vmem [shape: bf16[9,8,4], index: 0, kind: input, shape index: {}]   ;;  %s1494_s1 = inlined_call_operand.vmem [shape: bf16[2,4,384], index: 1, kind: input, shape index: {}]   ;;  %s1495_s2 = inlined_call_operand.hbm [shape: bf16[2,8,256], index: 2, kind: output, shape index: {0}]   ;;  %s1496_s3 = inlined_call_operand.vmem [shape: f32[2,8,1], index: 3, kind: output, shape index: {1}]   ;;  %s1497_s4 = inlined_call_operand.vmem [shape: f32[2,8,1], index: 4, kind: output, shape index: {2}]  }
   0x1   :  { %12 = vsyncpa [#allocation3 + $0x1], 0  ;;  %s1301_s15 = smov 0   ;;  %s1303_s16 = smov 0  }
   0x2   :  { %s1305_s17 = smov 0   ;;  %s1307_s18 = smov 0  }
   0x3 LB: > { %s1322_s19 = sadd.s32 4294967295, %s1263_s18   ;;  %s1088_s20 = sadd.s32 4294967294, %s1263_s18   ;;  %s1263_s18 = sphi %s1307_s18, %s1503_s18   ;;  %s1259_s17 = sphi %s1305_s17, %s1502_s17   ;;  %s1255_s16 = sphi %s1303_s16, %s1501_s16   ;;  %s1251_s15 = sphi %s1301_s15, %s1500_s15  }
   0x4   : > { %s1326_s21 = sadd.s32 1, %s1263_s18   ;;  %s72_s22 = sadd.s32 1, %s1259_s17 }
   0x5   : > { %s69_s23 = ssub.s32 %s1263_s18, %s1326_s21  ;;  %p82_p0 = scmp.ne.s32.totalorder %s1259_s17, %s1255_s16 }
   0x6   : > { %p70_p1 = scmp.eq.s32.totalorder %s69_s23, 0  ;;  %p83_p2 = scmp.eq.s32.totalorder %s1322_s19, 1 }
   0x7   : > { %p88_p3 = scmp.ne.s32.totalorder %s1255_s16, %s1251_s15  ;;  %p89_p4 = scmp.eq.s32.totalorder %s1088_s20, 1 }
   0x8   : > { %s1337_s24 = scalar_select %p70_p1, %s1259_s17, %s72_s22  }
   0x9   : > { %p1339_p5 = por %p83_p2, %p82_p0  ;;  %p1343_p6 = por %p89_p4, %p88_p3 }
   0xa   : > { %p1091_p7 = scmp.ge.s32.totalorder %s1263_s18, 1  ;;  %p170_p8 = scmp.lt.s32.totalorder %s1263_s18, 3 }
   0xc   : > { %p171_p9 = pnand %p1091_p7, %p170_p8 }
   0xd   : > { %p204_p10 = scmp.lt.s32.totalorder (!%p171_p9), %s1322_s19, 1  ;;  %v218_v0 = vlaneseq (!%p171_p9)  ;;  %v1265_v1 = vmov (!%p171_p9), 1983009808   ;;  %v1266_v3 = vmov (!%p171_p9), 0   ;;  %s1267_s6 = smov (!%p171_p9), 96   ;;  %vm284_vm0 = vcmask (!%p171_p9), 1041408  }
   0xe   : > { %174 = sbr.rel (%p171_p9) target bundleno = 557 (0x22d), region = 28  ;;  %v257_v2 = vunpack.c.l.s4 (!%p171_p9), %v1265_v1  ;;  %382 = vmatprep.mubr.bf16.mxu0 (!%p171_p9), %v1266_v3  ;;  %323 = vmatprep.mubr.bf16.mxu1 (!%p171_p9), %v1266_v3  ;;  %s1268_s7 = smov (!%p171_p9), 112   ;;  %v250_v21 = vld [vmem:[%s1493_s0] sm:$0xf] (!%p171_p9)  ;;  %vm280_vm1 = vcmask (!%p171_p9), 31744   ;;  %vm417_vm2 = vcmask (!%p171_p9), 785408  }
   0xf   : > { %v260_v4 = vshrl.u32 (!%p171_p9), %v218_v0, 7  ;;  %s1269_s8 = smov (!%p171_p9), 110   ;;  %s1270_s11 = smov (!%p171_p9), 111   ;;  %vm277_vm3 = vcmask (!%p171_p9), 916480   ;;  %v1102_v50 = vld [vmem:[%s1493_s0 + $0x18] sm:$0xf] (!%p171_p9) }
  0x10   : > { %v258_v5 = vunpack.c.0.s8 (!%p171_p9), %v257_v2  ;;  %s1271_s12 = smov (!%p171_p9), 126   ;;  %s1272_s13 = smov (!%p171_p9), 127   ;;  %vm731_vm4 = vcmask (!%p171_p9), 900096   ;;  %v1096_v57 = vld [vmem:[%s1493_s0 + $0xc] sm:$0xf] (!%p171_p9)  ;;  %vm508_vm5 = vcmask (!%p171_p9), 908288  }
  0x11   : > { %s1273_s14 = smov (!%p171_p9), 95   ;;  %s1274_s20 = smov (!%p171_p9), 94   ;;  %v1115_v62 = vld [vmem:[%s1493_s0 + $0x14] sm:$0xf] (!%p171_p9)  ;;  %vm790_vm6 = vcmask (!%p171_p9), 1031168   ;;  %vm567_vm7 = vcmask (!%p171_p9), 1039360  }
  0x12   : > { %v1357_v6 = vsub.s32 (!%p171_p9), %v258_v5, %v260_v4  ;;  %vm646_vm8 = vcmask (!%p171_p9), 777216   ;;  %vm869_vm9 = vcmask (!%p171_p9), 769024   ;;  %s189_s22 = sand.u32 (!%p171_p9), 1, %s1255_s16   ;;  %s1130_s29 = sshll.u32 (!%p171_p9), %s1322_s19, 7 }
  0x13   : > { %s1092_s23 = sshll.u32 (!%p171_p9), %s189_s22, 3  ;;  %s1275_s10 = smov (!%p171_p9), [#allocation2]  }
  0x15   : > { %s1353_s27 = scalar_select %p204_p10, %s1322_s19, 1 }
  0x17   : > { %s1145_s28 = smul.u32 6, %s1353_s27 }
  0x19   : > { %s1362_s5 = scalar_lea.vmem %s1494_s1, %s1145_s28  ;;  %s191_s28 = scalar_lea.vmem [#allocation2], %s1092_s23 }
  0x1a   : > { %v391_v7 = vld [vmem:[%s1362_s5] sm:$0x3f] }
  0x1b   : > { %v251_v8 = vld [vmem:[%s1362_s5] sm:$0x3f]  ;;  %v402_v10 = vrot.slane %v391_v7, %v1357_v6  ;;  %v395_v11 = vcombine.high %v391_v7, %v391_v7 }
  0x1c   : > { %v703_v9 = vld [vmem:[%s1362_s5] sm:$0x3f]  ;;  %v262_v12 = vrot.slane %v251_v8, %v1357_v6  ;;  %v255_v13 = vcombine.high %v251_v8, %v251_v8 }
  0x1d   : > { %411 = vrot.lane.b32.xlu0 %v402_v10, %s1267_s6  ;;  %v716_v14 = vrot.slane %v703_v9, %v1357_v6  ;;  %v409_v15 = vrot.slane %v395_v11, %v1357_v6  ;;  %v1099_v16 = vld.sshfl [vmem:[%s1362_s5] sm:$0x33 pattern:$0x76325410]  ;;  %v410_v19 = vcombine.high %v402_v10, %v402_v10  ;;  %v709_v24 = vcombine.high %v703_v9, %v703_v9 }
  0x1e   : > { %271 = vrot.lane.b32.xlu1 %v262_v12, %s1268_s7  ;;  %v340_v17 = vcombine.high %v1099_v16, %v1099_v16  ;;  %v345_v18 = vsel %vm284_vm0, %v1099_v16, 0  ;;  %v269_v20 = vrot.slane %v255_v13, %v1357_v6  ;;  %v270_v22 = vcombine.high %v262_v12, %v262_v12  ;;  %v480_v25 = vld [vmem:[%s1362_s5] sm:$0x3f] }
  0x1f   : > { %v724_v23 = vcombine.high %v716_v14, %v716_v14  ;;  %v723_v26 = vrot.slane %v709_v24, %v1357_v6  ;;  %v493_v27 = vrot.slane %v480_v25, %v1357_v6  ;;  %v486_v28 = vcombine.high %v480_v25, %v480_v25  ;;  %v620_v31 = vld [vmem:[%s1362_s5] sm:$0x3f] }
  0x20   : > { %1100 = vmatprep.subr.msk.bf16.mxu0 %vm284_vm0, %v340_v17  ;;  %v631_v32 = vrot.slane %v620_v31, %v1357_v6  ;;  %v624_v34 = vcombine.high %v620_v31, %v620_v31  ;;  %v843_v35 = vld [vmem:[%s1362_s5] sm:$0x3f] }
  0x21   : > { %725 = vrot.lane.b32.xlu0 %v716_v14, %s1269_s8  ;;  %351 = vmatpush1.bf16.msra.mxu0 %v345_v18  ;;  %v501_v29 = vcombine.high %v493_v27, %v493_v27  ;;  %v500_v30 = vrot.slane %v486_v28, %v1357_v6  ;;  %v854_v37 = vrot.slane %v843_v35, %v1357_v6  ;;  %v1111_v28 = vld [vmem:[%s1493_s0 + $0x1c] sm:$0xf] }
  0x22   : > { %415 = vrot.lane.b32.xlu1 %v409_v15, %s1267_s6  ;;  %v639_v33 = vcombine.high %v631_v32, %v631_v32  ;;  %v638_v36 = vrot.slane %v624_v34, %v1357_v6  ;;  %v847_v38 = vcombine.high %v843_v35, %v843_v35 }
  0x23   : > { %v862_v39 = vcombine.high %v854_v37, %v854_v37 }
  0x24   : > { %1101 = vmatmul.mubr.msk.bf16.vlgmr.msra.gmra.mrb[0].mxu0 %vm280_vm1, %v250_v21  ;;  %v861_v40 = vrot.slane %v847_v38, %v1357_v6  ;;  %v1106_v6 = vld [vmem:[%s1493_s0 + $0x10] sm:$0xf] }
  0x25   : > { %413 = vrot.lane.b32.xlu0 %v410_v19, %s1267_s6  ;;  %461 = vmatprep.mubr.bf16.mxu0 %v1266_v3  ;;  %s1450_s6 = scalar_lea.hbm %s1495_s2, %s1130_s29 }
  0x26   : > { %275 = vrot.lane.b32.xlu1 %v269_v20, %s1268_s7  ;;  %v1105_v20 = vld [vmem:[%s1493_s0 + $0x4] sm:$0xf] }
  0x29   : > { %273 = vrot.lane.b32.xlu0 %v270_v22, %s1268_s7  ;;  %s975_s7 = sshll.u32 %s191_s28, 4  ;;  %s976_s7 = int_to_ptr.vmem [resolvable:$true] %s975_s7 }
  0x2a   : > { %727 = vrot.lane.b32.xlu1 %v724_v23, %s1269_s8  ;;  %s1201_s9 = scalar_lea.vmem %s976_s7, 128 }
  0x2b   : > { %p1202_p11 = scmp.ne.s32.totalorder %s976_s7, %s1201_s9 }
  0x2d   : > { %729 = vrot.lane.b32.xlu0 %v723_v26, %s1269_s8  ;;  %s953_s8 = scalar_lea.sflag [#allocation3], %s189_s22  ;;  %p1203_p12 = pnand %p1202_p11, %p1339_p5 }
  0x2e   : > { %502 = vrot.lane.b32.xlu1 %v493_v27, %s1270_s11 }
  0x2f   : > { %p1204_p13 = pneg %p1203_p12 }
  0x31   : > { %504 = vrot.lane.b32.xlu0 %v501_v29, %s1270_s11 }
  0x32   : > { %506 = vrot.lane.b32.xlu1 %v500_v30, %s1270_s11  ;;  %s1205_s11 = sshll.u32 %s1275_s10, 4  ;;  %s1206_s11 = int_to_ptr.vmem [resolvable:$false] %s1205_s11 }
  0x33   : > { %p1208_p0 = scmp.lt.s32.totalorder %s976_s7, %s1206_s11 }
  0x35   : > { %784 = vrot.lane.b32.xlu0 %v716_v14, %s1271_s12  ;;  %v1114_v14 = vld [vmem:[%s1493_s0 + $0x8] sm:$0xf] }
  0x36   : > { %786 = vrot.lane.b32.xlu1 %v724_v23, %s1271_s12 }
  0x39   : > { %788 = vrot.lane.b32.xlu0 %v723_v26, %s1271_s12  ;;  %s1207_s12 = scalar_lea.vmem %s1206_s11, 256 }
  0x3a   : > { %561 = vrot.lane.b32.xlu1 %v493_v27, %s1272_s13  ;;  %p1209_p1 = scmp.lt.s32.totalorder %s1207_s12, %s1201_s9 }
  0x3c   : > { %p1210_p2 = por %p1209_p1, %p1208_p0 }
  0x3d   : > { %563 = vrot.lane.b32.xlu0 %v501_v29, %s1272_s13 }
  0x3e   : > { %565 = vrot.lane.b32.xlu1 %v500_v30, %s1272_s13  ;;  %p1211_p3 = pnand %p1210_p2, %p1204_p13 }
  0x41   : > { %640 = vrot.lane.b32.xlu0 %v631_v32, %s1273_s14 }
  0x42   : > { %642 = vrot.lane.b32.xlu1 %v639_v33, %s1273_s14 }
  0x45   : > { %644 = vrot.lane.b32.xlu0 %v638_v36, %s1273_s14 }
  0x46   : > { %863 = vrot.lane.b32.xlu1 %v854_v37, %s1274_s20 }
  0x49   : > { %865 = vrot.lane.b32.xlu0 %v862_v39, %s1274_s20 }
  0x4a   : > { %867 = vrot.lane.b32.xlu1 %v861_v40, %s1274_s20 }
  0x8f   : > { %v412_v41 = vpop.permute.xlu0 %411 }
  0x90   : > { %v272_v42 = vpop.permute.xlu1 %271 }
  0x93   : > { %v726_v43 = vpop.permute.xlu0 %725 }
  0x94   : > { %v416_v44 = vpop.permute.xlu1 %415 }
  0x97   : > { %v414_v45 = vpop.permute.xlu0 %413 }
  0x98   : > { %v276_v46 = vpop.permute.xlu1 %275  ;;  %v418_v47 = vsel %vm417_vm2, %v412_v41, %v414_v45  ;;  %v419_v48 = vsel %vm417_vm2, %v414_v45, %v416_v44 }
  0x99   : > { %v424_v49 = vsel %vm284_vm0, %v418_v47, 0  ;;  %1103 = vmatprep.subr.msk.bf16.mxu0 %vm284_vm0, %v419_v48  ;;  %v219_v48 = vand.u32 127, %v218_v0 }
  0x9a   : > { %430 = vmatpush1.bf16.msra.mxu0 %v424_v49 }
  0x9b   : > { %v274_v51 = vpop.permute.xlu0 %273  ;;  %v220_v49 = vadd.s32 128, %v219_v48 }
  0x9c   : > { %v728_v52 = vpop.permute.xlu1 %727  ;;  %v279_v53 = vsel %vm277_vm3, %v274_v51, %v276_v46  ;;  %v278_v54 = vsel %vm277_vm3, %v272_v42, %v274_v51 }
  0x9d   : > { %1097 = vmatprep.subr.msk.bf16.mxu1 %vm284_vm0, %v279_v53  ;;  %1104 = vmatmul.mubr.msk.bf16.vlgmr.msra.gmra.mrb[0].mxu0 %vm280_vm1, %v1102_v50  ;;  %v286_v55 = vsel %vm284_vm0, %v278_v54, 0  ;;  %v732_v56 = vsel %vm731_vm4, %v726_v43, %v728_v52 }
  0x9e   : > { %292 = vmatpush1.bf16.msra.mxu1 %v286_v55  ;;  %775 = vmatprep.mubr.bf16.mxu0 %v1266_v3  ;;  %v738_v61 = vsel %vm284_vm0, %v732_v56, 0  ;;  %v225_v55 = vand.u32 15, %v219_v48 }
  0x9f   : > { %v730_v58 = vpop.permute.xlu0 %729 }
  0xa0   : > { %v503_v59 = vpop.permute.xlu1 %502  ;;  %v733_v60 = vsel %vm731_vm4, %v728_v52, %v730_v58  ;;  %vm245_vm10 = vcmp.gt.s32.totalorder %v225_v55, 0  ;;  %vm247_vm12 = vcmp.lt.s32.totalorder %v225_v55, 15 }
  0xa1   : > { %1098 = vmatmul.mubr.msk.bf16.vlgmr.msra.gmra.mrb[0].mxu1 %vm280_vm1, %v1096_v57  ;;  %1116 = vmatprep.subr.msk.bf16.mxu0 %vm284_vm0, %v733_v60  ;;  %v232_v57 = vand.u32 15, %v220_v49 }
  0xa2   : > { %744 = vmatpush1.bf16.msra.mxu0 %v738_v61  ;;  %552 = vmatprep.mubr.bf16.mxu1 %v1266_v3 }
  0xa3   : > { %v505_v63 = vpop.permute.xlu0 %504  ;;  %vm246_vm11 = vcmp.gt.s32.totalorder %v232_v57, 0  ;;  %vm248_vm13 = vcmp.lt.s32.totalorder %v232_v57, 15 }
  0xa4   : > { %v507_v1 = vpop.permute.xlu1 %506  ;;  %v509_v2 = vsel %vm508_vm5, %v503_v59, %v505_v63 }
  0xa5   : > { %v510_v4 = vsel %vm508_vm5, %v505_v63, %v507_v1  ;;  %v515_v5 = vsel %vm284_vm0, %v509_v2, 0  ;;  %1117 = vmatmul.mubr.msk.bf16.vlgmr.msra.gmra.mrb[4].mxu0 %vm280_vm1, %v1115_v62 }
  0xa6   : > { %1107 = vmatprep.subr.msk.bf16.mxu1 %vm284_vm0, %v510_v4  ;;  %834 = vmatprep.mubr.bf16.mxu0 %v1266_v3 }
  0xa7   : > { %521 = vmatpush1.bf16.msra.mxu1 %v515_v5  ;;  %v785_v7 = vpop.permute.xlu0 %784 }
  0xa8   : > { %v787_v8 = vpop.permute.xlu1 %786 }
  0xa9   : > { %v791_v9 = vsel %vm790_vm6, %v785_v7, %v787_v8 }
  0xaa   : > { %1108 = vmatmul.mubr.msk.bf16.vlgmr.msra.gmra.mrb[4].mxu1 %vm280_vm1, %v1106_v6  ;;  %v797_v13 = vsel %vm284_vm0, %v791_v9, 0 }
  0xab   : > { %611 = vmatprep.mubr.bf16.mxu1 %v1266_v3  ;;  %v789_v10 = vpop.permute.xlu0 %788 }
  0xac   : > { %v562_v11 = vpop.permute.xlu1 %561  ;;  %v792_v12 = vsel %vm790_vm6, %v787_v8, %v789_v10 }
  0xad   : > { %1118 = vmatprep.subr.msk.bf16.mxu0 %vm284_vm0, %v792_v12 }
  0xae   : > { %803 = vmatpush1.bf16.msra.mxu0 %v797_v13 }
  0xaf   : > { %v564_v15 = vpop.permute.xlu0 %563 }
  0xb0   : > { %v566_v16 = vpop.permute.xlu1 %565  ;;  %v568_v17 = vsel %vm567_vm7, %v562_v11, %v564_v15 }
  0xb1   : > { %v569_v18 = vsel %vm567_vm7, %v564_v15, %v566_v16  ;;  %v574_v19 = vsel %vm284_vm0, %v568_v17, 0  ;;  %1119 = vmatmul.mubr.msk.bf16.vlgmr.msra.gmra.mrb[4].mxu0 %vm280_vm1, %v1114_v14 }
  0xb2   : > { %1109 = vmatprep.subr.msk.bf16.mxu1 %vm284_vm0, %v569_v18  ;;  %913 = vmatprep.mubr.bf16.mxu0 %v1266_v3 }
  0xb3   : > { %580 = vmatpush1.bf16.msra.mxu1 %v574_v19  ;;  %v641_v21 = vpop.permute.xlu0 %640 }
  0xb4   : > { %v643_v22 = vpop.permute.xlu1 %642 }
  0xb5   : > { %v647_v23 = vsel %vm646_vm8, %v641_v21, %v643_v22 }
  0xb6   : > { %1110 = vmatmul.mubr.msk.bf16.vlgmr.msra.gmra.mrb[8].mxu1 %vm280_vm1, %v1105_v20  ;;  %v653_v27 = vsel %vm284_vm0, %v647_v23, 0 }
  0xb7   : > { %690 = vmatprep.mubr.bf16.mxu1 %v1266_v3  ;;  %v645_v24 = vpop.permute.xlu0 %644  ;;  %v1120_v3 = vld [vmem:[%s1493_s0 + $0x20] sm:$0xf] }
  0xb8   : > { %v864_v25 = vpop.permute.xlu1 %863  ;;  %v648_v26 = vsel %vm646_vm8, %v643_v22, %v645_v24 }
  0xb9   : > { %1112 = vmatprep.subr.msk.bf16.mxu1 %vm284_vm0, %v648_v26 }
  0xba   : > { %659 = vmatpush1.bf16.msra.mxu1 %v653_v27 }
  0xbb   : > { %v866_v29 = vpop.permute.xlu0 %865 }
  0xbc   : > { %v868_v30 = vpop.permute.xlu1 %867  ;;  %v870_v31 = vsel %vm869_vm9, %v864_v25, %v866_v29 }
  0xbd   : > { %v871_v32 = vsel %vm869_vm9, %v866_v29, %v868_v30  ;;  %v876_v33 = vsel %vm284_vm0, %v870_v31, 0 }
  0xbe   : > { %1113 = vmatmul.mubr.msk.bf16.vlgmr.msra.gmra.mrb[12].mxu1 %vm280_vm1, %v1111_v28  ;;  %1121 = vmatprep.subr.msk.bf16.mxu0 %vm284_vm0, %v871_v32 }
  0xbf   : > { %882 = vmatpush1.bf16.msra.mxu0 %v876_v33 }
  0xc2   : > { %1122 = vmatmul.mubr.msk.bf16.vlgmr.msra.gmra.mrb[4].mxu0 %vm280_vm1, %v1120_v3 }
 0x170   : > { %v463_v34 = vpop.f32.mrb[0].mxu0 }
 0x171   : > { %v465_v35 = vpop.f32.mrb[1].mxu0 }
 0x172   : > { %v467_v36 = vpop.f32.mrb[2].mxu0 }
 0x173   : > { %v468_v37 = vpop.f32.mrb[3].mxu0 }
 0x174   : > { %v325_v38 = vpop.f32.mrb[0].mxu1 }
 0x175   : > { %v1131_v39 = vadd.f32 %v463_v34, %v325_v38  ;;  %v327_v40 = vpop.f32.mrb[1].mxu1 }
 0x176   : > { %v1132_v41 = vadd.f32 %v465_v35, %v327_v40  ;;  %v329_v42 = vpop.f32.mrb[2].mxu1 }
 0x177   : > { %v330_v43 = vpop.f32.mrb[3].mxu1  ;;  %v476_v61 = vsel %vm245_vm10, %v1131_v39, 0.0 }
 0x178   : > { %v477_v0 = vsel %vm246_vm11, %v1132_v41, 0.0 }
 0x17d   : > { %v554_v44 = vpop.f32.mrb[4].mxu1 }
 0x17e   : > { %v556_v45 = vpop.f32.mrb[5].mxu1 }
 0x17f   : > { %v558_v46 = vpop.f32.mrb[6].mxu1 }
 0x180   : > { %v559_v47 = vpop.f32.mrb[7].mxu1 }
 0x189   : > { %v613_v50 = vpop.f32.mrb[8].mxu1 }
 0x18a   : > { %v614_v51 = vadd.f32 %v613_v50, %v554_v44  ;;  %v615_v52 = vpop.f32.mrb[9].mxu1 }
 0x18b   : > { %v616_v53 = vadd.f32 %v615_v52, %v556_v45  ;;  %v617_v54 = vpop.f32.mrb[10].mxu1 }
 0x18c   : > { %v618_v56 = vpop.f32.mrb[11].mxu1 }
 0x191   : > { %v692_v58 = vpop.f32.mrb[12].mxu1 }
 0x192   : > { %v699_v59 = vadd.f32 %v692_v58, %v614_v51  ;;  %v694_v60 = vpop.f32.mrb[13].mxu1 }
 0x193   : > { %v700_v62 = vadd.f32 %v694_v60, %v616_v53  ;;  %v696_v63 = vpop.f32.mrb[14].mxu1 }
 0x194   : > { %v701_v1 = vadd.f32 %v699_v59, %v476_v61  ;;  %v697_v2 = vpop.f32.mrb[15].mxu1 }
 0x195   : > { %v702_v4 = vadd.f32 %v700_v62, %v477_v0  ;;  %v915_v5 = vpop.f32.mrb[4].mxu0 }
 0x196   : > { %v928_v6 = vsel %vm247_vm12, %v915_v5, 0.0  ;;  %v917_v7 = vpop.f32.mrb[5].mxu0 }
 0x197   : > { %v930_v8 = vadd.f32 %v928_v6, %v701_v1  ;;  %v929_v9 = vsel %vm248_vm13, %v917_v7, 0.0  ;;  %v919_v10 = vpop.f32.mrb[6].mxu0 }
 0x198   : > { %v931_v11 = vadd.f32 %v929_v9, %v702_v4  ;;  %v920_v12 = vpop.f32.mrb[7].mxu0 }
 0x199   : > { %v946_v13 = vmul.f32 %v930_v8, %v930_v8 }
 0x19a   : > { %v941_v14 = vadd.f32 %v931_v11, %v930_v8  ;;  %v947_v15 = vmul.f32 %v931_v11, %v931_v11  ;;  %v1129_v16 = vpack.c.bf16 %v931_v11, %v930_v8 }
 0x19c   : > { %942 = vadd.xlane.f32.xlu0 %v941_v14  ;;  %v948_v17 = vadd.f32 %v947_v15, %v946_v13  ;;  %940 = vst [vmem:[%s191_s28] sm:$0xff] %v1129_v16 }
 0x19e   : > { %949 = vadd.xlane.f32.xlu1 %v948_v17 }
 0x19f   : > { %1214 = shalt.err (!%p1211_p3)
}
 0x1a0   : > { %s1215_s19 = scalar_lea.hbm %s1450_s6, 128  ;;  %s1219_s20 = scalar_lea.hbm %s1495_s2, 256 }
 0x1a1   : > { %p1216_p4 = scmp.ne.s32.totalorder %s1450_s6, %s1215_s19  ;;  %p1220_p9 = scmp.lt.u32.totalorder %s1450_s6, %s1495_s2 }
 0x1a2   : > { %p1221_p10 = scmp.lt.u32.totalorder %s1219_s20, %s1215_s19  ;;  %p1223_p12 = scmp.lt.u32.totalorder %s1215_s19, %s1450_s6 }
 0x1a3   : > { %p1217_p7 = pnand %p1216_p4, %p1339_p5 }
 0x1a4   : > { %p1222_p11 = por %p1221_p10, %p1220_p9 }
 0x1a5   : > { %p1218_p8 = pneg %p1217_p7 }
 0x1a6   : > { %p1224_p13 = por %p1223_p12, %p1222_p11 }
 0x1a8   : > { %p1225_p0 = pnand %p1224_p13, %p1218_p8 }
 0x1aa   : > { %1228 = shalt.err (!%p1225_p0)
}
 0x1ab   : > { %1146 = dma.vmem_to_hbm [thread:$0]  (%p1339_p5), %s976_s7, 128, %s1450_s6, %s953_s8   ;;  %vm944_vm14 = vcmask 7168  }
 0x1ac   : > { %s1094_s28 = sshll.u32 %s1353_s27, 3 }
 0x1ad   : > { %s212_s5 = scalar_lea.vmem %s1496_s3, %s1094_s28  ;;  %s216_s11 = scalar_lea.vmem %s1497_s4, %s1094_s28 }
 0x229   : > { %v943_v18 = vpop.xlane.xlu0 %942 }
 0x22a   : > { %945 = vst.msk [vmem:[%s212_s5] sm:$0xff] %vm944_vm14, %v943_v18 }
 0x22b   : > { %v950_v19 = vpop.xlane.xlu1 %949 }
 0x22c   : > { %951 = vst.msk [vmem:[%s216_s11] sm:$0xff] %vm944_vm14, %v950_v19 }
 0x22d PF: > { %p1152_p1 = scmp.ge.s32.totalorder %s1263_s18, 2  ;;  %s993_s25 = sand.u32 1, %s1251_s15  }
 0x22e   : > { %s994_s27 = scalar_lea.sflag [#allocation3], %s993_s25 }
 0x22f   : > { %p1149_p5 = pnand %p1152_p1, %p1343_p6 }
 0x231   : > { %1246 = dma.done.wait (!%p1149_p5), %s994_s27, 128  }
 0x232   : > { %1248 = vsyncadd (!%p1149_p5), %s994_s27, 4294967168  ;;  %p15_p2 = scmp.ge.s32.totalorder %s1326_s21, 4   ;;  %s1500_s15 = smov %s1255_s16 }
 0x233   : > { %s1501_s16 = smov %s1259_s17  ;;  %s1502_s17 = smov %s1337_s24 }
 0x234   : > { %s1503_s18 = smov %s1326_s21  ;;  %17 = sbr.rel (!%p15_p2) target bundleno = 3 (0x3), region = 95 }
 0x23b   :  { %1013 = vsyncpa [#allocation3], 1 }
 0x23c   :  { %1015 = vsyncpa [#allocation3 + $0x1], 1 }

</bundles_post_ra>
